<compile_context>
chip_gen: v7x
topology: tpu7x:2x2x1
jax: 0.10.0
libtpu: 0.0.40
codegen_flags: <defaults>
</compile_context>

<pallas_src>
import functools
import math

import jax
import jax.numpy as jnp
from jax.experimental import pallas as pl
from jax.experimental.pallas import tpu as pltpu


def _round_up(x, m):
    return ((x + m - 1) // m) * m


def _cdiv(a, b):
    return (a + b - 1) // b


# --------------------------------------------------------------------------
# Kernel 1: support = X @ W   (small, row-tiled, computed once)
# --------------------------------------------------------------------------
def _support_kernel(x_ref, w_ref, s_ref):
    s_ref[...] = jnp.dot(
        x_ref[...], w_ref[...], preferred_element_type=jnp.float32
    ).astype(s_ref.dtype)


# --------------------------------------------------------------------------
# Kernel 2: out = A @ support  (k-reduction, accumulate directly into o_ref)
# --------------------------------------------------------------------------
def _aggregate_kernel(a_ref, s_ref, o_ref, *, tk, support_resident):
    k = pl.program_id(1)
    if support_resident:
        # Full support lives in VMEM; slice the current k-tile.
        start = pl.multiple_of(k * tk, 128)
        s_blk = s_ref[pl.ds(start, tk), :]
    else:
        s_blk = s_ref[...]

    part = jnp.dot(a_ref[...], s_blk, preferred_element_type=jnp.float32)

    @pl.when(k == 0)
    def _():
        o_ref[...] = part

    @pl.when(k > 0)
    def _():
        o_ref[...] += part


def graph_convolution_forward(adjacency, feature, weight, *,
                              use_bf16=True, max_tm=512, max_tk=4096,
                              force_support_resident=None):
    """GraphConvolution forward: out = A @ (X @ W).

    A: dense adjacency (N, N); X: features (N, D_in); W: (D_in, D_out).
    """
    n, n2 = adjacency.shape
    assert n == n2
    d_in = feature.shape[1]
    d_out = weight.shape[1]
    assert feature.shape == (n, d_in)
    assert weight.shape == (d_in, d_out)

    compute_dtype = jnp.bfloat16 if use_bf16 else jnp.float32
    item = jnp.dtype(compute_dtype).itemsize
    d_pad = _round_up(d_out, 128)            # lane-dense output dim

    # ---- generation-aware VMEM budget (v7x: 64 MiB, v5e/v6e: 128 MiB) -----
    try:
        vmem_capacity = int(pltpu.get_tpu_info().vmem_capacity_bytes)
    except Exception:
        vmem_capacity = 64 * 1024 * 1024     # conservative (v7x) fallback
    vmem_limit = vmem_capacity * 3 // 4      # explicit scoped limit w/ headroom
    block_budget = vmem_capacity * 6 // 10   # what we allow our blocks to use

    # ---- row tiling: pad rows of A / out only to a multiple of tm ----------
    max_tm = max(16, (max_tm // 16) * 16)
    nm = _cdiv(n, max_tm)
    tm = _round_up(_cdiv(n, nm), 16)
    n_row_pad = nm * tm

    # ---- k tiling: pad reduction dim only to a multiple of tk --------------
    out_blk_bytes = 2 * tm * d_pad * 4
    support_full_est = 2 * _round_up(n, 128) * d_pad * item
    avail_for_a = block_budget - out_blk_bytes - support_full_est
    want_resident = avail_for_a >= 2 * tm * 128 * item
    if want_resident:
        tk_cap = avail_for_a // (2 * tm * item)
    else:
        # support streamed per k-tile: 2*tm*tk + 2*tk*d_pad (+ out) must fit.
        tk_cap = (block_budget - out_blk_bytes) // (2 * item * (tm + d_pad))
    tk = max(128, min((tk_cap // 128) * 128, max_tk, _round_up(n, 128)))
    nk = _cdiv(n, tk)
    tk = _round_up(_cdiv(n, nk), 128)        # shrink tk to minimize k padding
    n_k_pad = nk * tk

    support_resident = want_resident and (
        2 * tm * tk * item + 2 * n_k_pad * d_pad * item + out_blk_bytes
        <= block_budget)
    if force_support_resident is not None:
        support_resident = bool(force_support_resident)

    # ---- pad inputs (single fused cast + pad; zero padding is inert) -------
    a_pad = adjacency.astype(compute_dtype)
    if n_row_pad != n or n_k_pad != n:
        a_pad = jnp.pad(a_pad, ((0, n_row_pad - n), (0, n_k_pad - n)))
    x_pad = feature.astype(jnp.float32)
    if n_k_pad != n:
        x_pad = jnp.pad(x_pad, ((0, n_k_pad - n), (0, 0)))
    w_pad = weight.astype(jnp.float32)
    if d_pad != d_out:
        w_pad = jnp.pad(w_pad, ((0, 0), (0, d_pad - d_out)))

    # ---- kernel 1: support = X @ W ------------------------------------------
    tm_sup = 512
    while n_k_pad % tm_sup:
        tm_sup //= 2                          # n_k_pad is a multiple of 128
    support_cost = pl.CostEstimate(
        flops=2 * n_k_pad * d_in * d_pad,
        transcendentals=0,
        bytes_accessed=(n_k_pad * d_in + d_in * d_pad) * 4
        + n_k_pad * d_pad * item,
    )
    support = pl.pallas_call(
        _support_kernel,
        out_shape=jax.ShapeDtypeStruct((n_k_pad, d_pad), compute_dtype),
        grid_spec=pltpu.PrefetchScalarGridSpec(
            num_scalar_prefetch=0,
            grid=(n_k_pad // tm_sup,),
            in_specs=[
                pl.BlockSpec((tm_sup, d_in), lambda i: (i, 0)),
                pl.BlockSpec((d_in, d_pad), lambda i: (0, 0)),
            ],
            out_specs=pl.BlockSpec((tm_sup, d_pad), lambda i: (i, 0)),
        ),
        compiler_params=pltpu.CompilerParams(
            dimension_semantics=("parallel",),
            vmem_limit_bytes=vmem_limit,
        ),
        cost_estimate=support_cost,
    )(x_pad, w_pad)

    # ---- kernel 2: out = A @ support ----------------------------------------
    if support_resident:
        s_spec = pl.BlockSpec((n_k_pad, d_pad), lambda i, k: (0, 0))
        s_bytes = n_k_pad * d_pad * item                  # fetched once
    else:
        s_spec = pl.BlockSpec((tk, d_pad), lambda i, k: (k, 0))
        s_bytes = nm * n_k_pad * d_pad * item             # re-fetched per row tile

    agg_cost = pl.CostEstimate(
        flops=2 * n_row_pad * n_k_pad * d_pad,
        transcendentals=0,
        bytes_accessed=n_row_pad * n_k_pad * item + s_bytes
        + n_row_pad * d_pad * 4,
    )
    kernel2 = functools.partial(
        _aggregate_kernel, tk=tk, support_resident=support_resident)
    out_pad = pl.pallas_call(
        kernel2,
        out_shape=jax.ShapeDtypeStruct((n_row_pad, d_pad), jnp.float32),
        grid_spec=pltpu.PrefetchScalarGridSpec(
            num_scalar_prefetch=0,
            grid=(nm, nk),                    # reduction (k) axis last
            in_specs=[
                pl.BlockSpec((tm, tk), lambda i, k: (i, k)),
                s_spec,
            ],
            out_specs=pl.BlockSpec((tm, d_pad), lambda i, k: (i, 0)),
        ),
        compiler_params=pltpu.CompilerParams(
            dimension_semantics=("parallel", "arbitrary"),
            vmem_limit_bytes=vmem_limit,
        ),
        cost_estimate=agg_cost,
    )(a_pad, support)

    return out_pad[:n, :d_out]


def kaiming_uniform(key, shape):
    """Mimic torch.nn.init.kaiming_uniform_ defaults."""
    fan_in = shape[1]
    bound = math.sqrt(6.0 / fan_in)
    return jax.random.uniform(key, shape, jnp.float32, minval=-bound, maxval=bound)


def reference_forward(adjacency, feature, weight):
    support = jnp.matmul(feature, weight, precision="highest")
    return jnp.matmul(adjacency, support, precision="highest")


def _make_inputs(key, n, d_in, d_out):
    k_adj, k_feat, k_w = jax.random.split(key, 3)
    # Symmetric, row-normalized dense adjacency with self-loops (dense stand-in
    # for the torch sparse adjacency).
    raw = jax.random.uniform(k_adj, (n, n), jnp.float32)
    adj_bin = (raw + raw.T > 1.2).astype(jnp.float32) + jnp.eye(n, dtype=jnp.float32)
    deg = jnp.sum(adj_bin, axis=1, keepdims=True)
    adjacency = adj_bin / deg
    feature = jax.random.normal(k_feat, (n, d_in), jnp.float32)
    weight = kaiming_uniform(k_w, (d_in, d_out))
    return adjacency, feature, weight


if __name__ == "__main__":
    key = jax.random.PRNGKey(0)

    # ---- case 1: module-sized shapes (N=8, D_in=16, D_out=32) --------------
    N, INPUT_DIM, OUTPUT_DIM = 8, 16, 32
    adjacency, feature, weight = _make_inputs(key, N, INPUT_DIM, OUTPUT_DIM)
    ref = reference_forward(adjacency, feature, weight)

    # f32 path (exact).
    out = graph_convolution_forward(adjacency, feature, weight, use_bf16=False)
    out = jax.block_until_ready(out)
    assert out.shape == (N, OUTPUT_DIM)
    assert jnp.allclose(out, ref, atol=1e-5, rtol=1e-5)

    # bf16 A / support (default, bandwidth-optimized) with f32 accumulation.
    out_bf16 = graph_convolution_forward(adjacency, feature, weight)
    out_bf16 = jax.block_until_ready(out_bf16)
    assert out_bf16.shape == (N, OUTPUT_DIM)
    assert jnp.allclose(out_bf16, ref, atol=5e-2, rtol=5e-2)

    # ---- case 2: ragged N, multi-tile grid (exercises k accumulation,
    #      independent row/k padding, and both support BlockSpec paths) ------
    N2 = 300
    adjacency2, feature2, weight2 = _make_inputs(
        jax.random.PRNGKey(1), N2, INPUT_DIM, OUTPUT_DIM)
    ref2 = reference_forward(adjacency2, feature2, weight2)

    out2 = graph_convolution_forward(
        adjacency2, feature2, weight2, use_bf16=False, max_tm=128, max_tk=128)
    out2 = jax.block_until_ready(out2)
    assert out2.shape == (N2, OUTPUT_DIM)
    assert jnp.allclose(out2, ref2, atol=1e-4, rtol=1e-4)

    out2_stream = graph_convolution_forward(
        adjacency2, feature2, weight2, use_bf16=False, max_tm=128, max_tk=128,
        force_support_resident=False)
    out2_stream = jax.block_until_ready(out2_stream)
    assert jnp.allclose(out2_stream, ref2, atol=1e-4, rtol=1e-4)

    print("KERNEL_OK")
</pallas_src>

<mosaic_0001>
module attributes {stable_mosaic.version = 11 : i64} {
  func.func @_support_kernel(%arg0: i32, %arg1: memref<128x16xf32, #tpu.memory_space<vmem>>, %arg2: memref<16x128xf32, #tpu.memory_space<vmem>>, %arg3: memref<128x128xf32, #tpu.memory_space<vmem>>) attributes {dimension_semantics = [#tpu.dimension_semantics<parallel>], iteration_bounds = array<i64: 1>, scalar_prefetch = 0 : i64, scratch_operands = 0 : i64, tpu.core_type = #tpu.core_type<tc>, window_params = [{transform_indices = @transform_0, window_bounds = array<i64: 128, 16>}, {pipeline_mode = #tpu.pipeline_mode<synchronous>, transform_indices = @transform_1, window_bounds = array<i64: 16, 128>}, {transform_indices = @transform_2, window_bounds = array<i64: 128, 128>}]} {
    %c0 = arith.constant 0 : index
    %c0_0 = arith.constant 0 : index
    %0 = vector.load %arg1[%c0, %c0_0] : memref<128x16xf32, #tpu.memory_space<vmem>>, vector<128x16xf32>
    %c0_1 = arith.constant 0 : index
    %c0_2 = arith.constant 0 : index
    %1 = vector.load %arg2[%c0_1, %c0_2] : memref<16x128xf32, #tpu.memory_space<vmem>>, vector<16x128xf32>
    %cst = arith.constant dense<0.000000e+00> : vector<128x128xf32>
    %2 = tpu.matmul %0, %1, %cst {dimension_numbers = #tpu.dot_dimension_numbers<[1], [0], [0], [1], [0, 0, 1, 1], [], []>} : vector<128x16xf32>, vector<16x128xf32>, vector<128x128xf32> -> vector<128x128xf32>
    %c0_3 = arith.constant 0 : index
    %c0_4 = arith.constant 0 : index
    %3 = vector.load %arg3[%c0_3, %c0_4] : memref<128x128xf32, #tpu.memory_space<vmem>>, vector<128x128xf32>
    tpu.vector_store %arg3[%c0_3, %c0_4], %2 {strides = array<i32>} : memref<128x128xf32, #tpu.memory_space<vmem>>, vector<128x128xf32>,
    return
  }
  func.func @transform_0(%arg0: i32) -> (i32, i32) {
    %c0_i32 = arith.constant 0 : i32
    %c0_i32_0 = arith.constant 0 : i32
    return %arg0, %c0_i32 : i32, i32
  }
  func.func @transform_1(%arg0: i32) -> (i32, i32) {
    %c0_i32 = arith.constant 0 : i32
    %c0_i32_0 = arith.constant 0 : i32
    %c0_i32_1 = arith.constant 0 : i32
    return %c0_i32, %c0_i32_0 : i32, i32
  }
  func.func @transform_2(%arg0: i32) -> (i32, i32) {
    %c0_i32 = arith.constant 0 : i32
    %c0_i32_0 = arith.constant 0 : i32
    return %arg0, %c0_i32 : i32, i32
  }
}

</mosaic_0001>

<bundles_post_ra>
// kernel: tpu_custom_call.1
= control target key start
LH: loop header
LB: loop body
LE: loop exit
PB: predicated region body
PF: predicated region fallthrough
CT: control target
= control target key end

     0   :  { %vm30_vm0 = vcmask 130048   ;;  %s451_s0 = inlined_call_operand.vmem [shape: f32[128,16], index: 0, kind: input, shape index: {}]   ;;  %s452_s1 = inlined_call_operand.vmem [shape: f32[16,128], index: 1, kind: input, shape index: {}]   ;;  %s453_s2 = inlined_call_operand.hbm [shape: f32[128,128], index: 2, kind: output, shape index: {}]  }
   0x1   :  { %v28_v0 = vld [vmem:[%s452_s1] sm:$0xff]  ;;  %v29_v1 = vld [vmem:[%s452_s1 + $0x8] sm:$0xff]  ;;  %v14_v7 = vld [vmem:[%s451_s0 + $0x10] sm:$0xff] }
   0x2   :  { %v12_v2 = vld [vmem:[%s451_s0] sm:$0xff]  ;;  %v318_v3 = vpack.c.bf16 %v29_v1, %v28_v0  ;;  %v13_v5 = vld [vmem:[%s451_s0 + $0x8] sm:$0xff]  ;;  %v22_v8 = vld [vmem:[%s451_s0 + $0x50] sm:$0xff] }
   0x3   :  { %294 = vmatprep.mubr.msk.f32.mxu0 %vm30_vm0, %v12_v2  ;;  %v20_v4 = vld [vmem:[%s451_s0 + $0x40] sm:$0xff]  ;;  %v21_v6 = vld [vmem:[%s451_s0 + $0x48] sm:$0xff] }
   0x4   :  { %306 = vmatprep.mubr.msk.f32.mxu1 %vm30_vm0, %v20_v4  ;;  %319 = vmatprep.subr.bf16.mxu0 %v318_v3 }
   0x5   :  { %322 = vmatprep.subr.bf16.mxu1 %v318_v3  ;;  %321 = vmatpush3.bf16.msra.mxu0 %v318_v3 }
   0x6   :  { %323 = vmatpush3.bf16.msra.mxu1 %v318_v3 }
   0x7   :  { %7 = vsyncpa [#allocation3], 0  ;;  %v15_v9 = vld [vmem:[%s451_s0 + $0x18] sm:$0xff]  ;;  %v16_v11 = vld [vmem:[%s451_s0 + $0x20] sm:$0xff] }
   0x8   :  { %295 = vmatmul.mubr.msk.f32.vlgmr.msra.gmra.mrb[0].mxu0 %vm30_vm0, %v13_v5  ;;  %v23_v10 = vld [vmem:[%s451_s0 + $0x58] sm:$0xff]  ;;  %v24_v12 = vld [vmem:[%s451_s0 + $0x60] sm:$0xff]  ;;  %v17_v13 = vld [vmem:[%s451_s0 + $0x28] sm:$0xff] }
   0x9   :  { %307 = vmatmul.mubr.msk.f32.vlgmr.msra.gmra.mrb[0].mxu1 %vm30_vm0, %v21_v6  ;;  %297 = vmatprep.mubr.msk.f32.mxu0 %vm30_vm0, %v14_v7  ;;  %v25_v14 = vld [vmem:[%s451_s0 + $0x68] sm:$0xff]  ;;  %v18_v15 = vld [vmem:[%s451_s0 + $0x30] sm:$0xff]  ;;  %v19_v17 = vld [vmem:[%s451_s0 + $0x38] sm:$0xff] }
   0xa   :  { %309 = vmatprep.mubr.msk.f32.mxu1 %vm30_vm0, %v22_v8  ;;  %v26_v16 = vld [vmem:[%s451_s0 + $0x70] sm:$0xff]  ;;  %v27_v18 = vld [vmem:[%s451_s0 + $0x78] sm:$0xff]  ;;  %s351_s0 = smov [#allocation2]  }
   0xb   :  { %s245_s16 = sshll.u32 %s351_s0, 4  ;;  %s246_s16 = int_to_ptr.vmem [resolvable:$true] %s245_s16 }
   0xc   :  { %298 = vmatmul.mubr.msk.f32.gmra.mrb[2].mxu0 %vm30_vm0, %v15_v9  ;;  %s327_s17 = scalar_lea.vmem %s246_s16, 2048  ;;  %p332_p1 = scmp.lt.s32.totalorder %s246_s16, %s246_s16 }
   0xd   :  { %310 = vmatmul.mubr.msk.f32.gmra.mrb[2].mxu1 %vm30_vm0, %v23_v10  ;;  %300 = vmatprep.mubr.msk.f32.mxu0 %vm30_vm0, %v16_v11  ;;  %p328_p0 = scmp.ne.s32.totalorder %s246_s16, %s327_s17  ;;  %p333_p2 = scmp.lt.s32.totalorder %s327_s17, %s327_s17 }
   0xe   :  { %312 = vmatprep.mubr.msk.f32.mxu1 %vm30_vm0, %v24_v12 }
   0xf   :  { %p334_p3 = por %p333_p2, %p332_p1 }
  0x10   :  { %301 = vmatmul.mubr.msk.f32.gmra.mrb[4].mxu0 %vm30_vm0, %v17_v13 }
  0x11   :  { %313 = vmatmul.mubr.msk.f32.gmra.mrb[4].mxu1 %vm30_vm0, %v25_v14  ;;  %303 = vmatprep.mubr.msk.f32.mxu0 %vm30_vm0, %v18_v15  ;;  %p335_p4 = pnand %p334_p3, %p328_p0 }
  0x12   :  { %315 = vmatprep.mubr.msk.f32.mxu1 %vm30_vm0, %v26_v16 }
  0x14   :  { %304 = vmatmul.mubr.msk.f32.gmra.mrb[6].mxu0 %vm30_vm0, %v19_v17 }
  0x15   :  { %316 = vmatmul.mubr.msk.f32.gmra.mrb[6].mxu1 %vm30_vm0, %v27_v18 }
  0xdb   :  { %v296_v19 = vpop.f32.mrb[0].mxu0 }
  0xdc   :  { %v308_v20 = vpop.f32.mrb[0].mxu1  ;;  %225 = vst [vmem:[#allocation2 + $0x8] sm:$0xff] %v296_v19  ;;  %v145_v21 = vpop.f32.mrb[1].mxu0 }
  0xdd   :  { %233 = vst [vmem:[#allocation2 + $0x48] sm:$0xff] %v308_v20  ;;  %v185_v22 = vpop.f32.mrb[1].mxu1  ;;  %224 = vst [vmem:[#allocation2] sm:$0xff] %v145_v21 }
  0xde   :  { %232 = vst [vmem:[#allocation2 + $0x40] sm:$0xff] %v185_v22 }
  0xdf   :  { %v299_v23 = vpop.f32.mrb[2].mxu0 }
  0xe0   :  { %v311_v24 = vpop.f32.mrb[2].mxu1  ;;  %227 = vst [vmem:[#allocation2 + $0x18] sm:$0xff] %v299_v23  ;;  %v155_v25 = vpop.f32.mrb[3].mxu0 }
  0xe1   :  { %235 = vst [vmem:[#allocation2 + $0x58] sm:$0xff] %v311_v24  ;;  %v195_v26 = vpop.f32.mrb[3].mxu1  ;;  %226 = vst [vmem:[#allocation2 + $0x10] sm:$0xff] %v155_v25 }
  0xe2   :  { %234 = vst [vmem:[#allocation2 + $0x50] sm:$0xff] %v195_v26 }
  0xe3   :  { %v302_v27 = vpop.f32.mrb[4].mxu0 }
  0xe4   :  { %v314_v28 = vpop.f32.mrb[4].mxu1  ;;  %229 = vst [vmem:[#allocation2 + $0x28] sm:$0xff] %v302_v27  ;;  %v165_v29 = vpop.f32.mrb[5].mxu0 }
  0xe5   :  { %237 = vst [vmem:[#allocation2 + $0x68] sm:$0xff] %v314_v28  ;;  %v205_v30 = vpop.f32.mrb[5].mxu1  ;;  %228 = vst [vmem:[#allocation2 + $0x20] sm:$0xff] %v165_v29 }
  0xe6   :  { %236 = vst [vmem:[#allocation2 + $0x60] sm:$0xff] %v205_v30 }
  0xe7   :  { %v305_v31 = vpop.f32.mrb[6].mxu0 }
  0xe8   :  { %v317_v32 = vpop.f32.mrb[6].mxu1  ;;  %231 = vst [vmem:[#allocation2 + $0x38] sm:$0xff] %v305_v31  ;;  %v175_v33 = vpop.f32.mrb[7].mxu0 }
  0xe9   :  { %239 = vst [vmem:[#allocation2 + $0x78] sm:$0xff] %v317_v32  ;;  %v215_v34 = vpop.f32.mrb[7].mxu1  ;;  %230 = vst [vmem:[#allocation2 + $0x30] sm:$0xff] %v175_v33 }
  0xea   :  { %238 = vst [vmem:[#allocation2 + $0x70] sm:$0xff] %v215_v34 }
  0xeb   :  { %338 = shalt.err (!%p335_p4)
}
  0xec   :  { %s339_s19 = scalar_lea.hbm %s453_s2, 2048 }
  0xed   :  { %p340_p5 = scmp.ne.s32.totalorder %s453_s2, %s339_s19  ;;  %p343_p6 = scmp.lt.u32.totalorder %s339_s19, %s453_s2 }
  0xef   :  { %p345_p7 = pnand %p343_p6, %p340_p5 }
  0xf1   :  { %348 = shalt.err (!%p345_p7)
}
  0xf2   :  { %s352_s24 = smov 128   ;;  %s353_s25 = smov 8  }
  0xf3   :  { %251 = dma.vmem_to_hbm [thread:$0]  %s246_s16, 2048, %s453_s2, [#allocation3], %s352_s24, %s352_s24, %s353_s25  }
  0xf4   :  { %349 = dma.done.wait [#allocation3], 2048  }
  0xf5   :  { %350 = vsyncadd [#allocation3], 4294965248 }
  0xf6   :  { %255 = vsyncpa [#allocation3], 1 }

</bundles_post_ra>
